<compile_context>
chip_gen: v7x
topology: tpu7x:2x2x1
jax: 0.10.0
libtpu: 0.0.40
codegen_flags: <defaults>
</compile_context>

<pallas_src>
import numpy as np
import jax
import jax.numpy as jnp
from jax.experimental import pallas as pl
from jax.experimental.pallas import tpu as pltpu

BN_EPS = 1e-5
BN_SCALE = float(1.0 / np.sqrt(1.0 + BN_EPS))  # eval-mode BatchNorm1d, default stats


# --------------------------------------------------------------------------
# Kernel
# --------------------------------------------------------------------------
def _make_kernel(input_dim, latent_dim):
    L = latent_dim

    def _lin(x_f32, w_ref, b_ref):
        # MXU matmul: bf16 operands, f32 accumulation; bias add in f32 (VPU).
        return jnp.dot(x_f32.astype(jnp.bfloat16), w_ref[...],
                       preferred_element_type=jnp.float32) + b_ref[...]

    def _resblock(x, w1, b1, w2, b2):
        # Linear -> BN(eval, folded) -> ReLU -> Linear -> BN(eval, folded)
        #   -> +identity -> ReLU
        out = jnp.maximum(_lin(x, w1, b1), 0.0)
        out = _lin(out, w2, b2)
        return jnp.maximum(out + x, 0.0)

    def kernel(x_ref, eps_ref,
               w1, b1, wr1a, br1a, wr1b, br1b, wh, bh,
               w3, b3, wr2a, br2a, wr2b, br2b, w4, b4,
               out_ref):
        x = x_ref[...]

        # ---------------- encode ----------------
        h = _lin(x, w1, b1)                          # fc1
        h = _resblock(h, wr1a, br1a, wr1b, br1b)     # res1
        ml = _lin(h, wh, bh)                         # fused fc21 | fc22 head
        mu = ml[:, :L]
        logvar = ml[:, L:]

        # ------------- reparameterize ------------
        z = mu + eps_ref[...] * jnp.exp(0.5 * logvar)

        # ---------------- decode ----------------
        d = _lin(z, w3, b3)                          # fc3
        d = _resblock(d, wr2a, br2a, wr2b, br2b)     # res2
        d = _lin(d, w4, b4)                          # fc4

        # single lane-dense packed store: [dec | mu | logvar]
        out_ref[...] = jnp.concatenate([d, mu, logvar], axis=-1)

    return kernel


# --------------------------------------------------------------------------
# Parameters
# --------------------------------------------------------------------------
def init_raw_params(key, input_dim, hidden_dim, latent_dim):
    """PyTorch-style nn.Linear init (nonzero biases) for every Linear."""
    D, H, L = input_dim, hidden_dim, latent_dim
    names_dims = [
        ("fc1", (D, H)),
        ("res1.fc1", (H, H)), ("res1.fc2", (H, H)),
        ("fc21", (H, L)), ("fc22", (H, L)),
        ("fc3", (L, H)),
        ("res2.fc1", (H, H)), ("res2.fc2", (H, H)),
        ("fc4", (H, D)),
    ]
    params = {}
    for name, (din, dout) in names_dims:
        key, kw, kb = jax.random.split(key, 3)
        bound = 1.0 / np.sqrt(din)
        w = jax.random.uniform(kw, (din, dout), jnp.float32, -bound, bound)
        b = jax.random.uniform(kb, (1, dout), jnp.float32, -bound, bound)
        params[name] = (w, b)
    return params


def prep_params(raw):
    """Fold eval-mode BN into weights, fuse the mu/logvar head, cast to bf16."""
    def fold_bn(w, b):
        # Linear followed by eval BatchNorm1d with default running stats:
        # y = (xW + b) / sqrt(1 + eps)
        return w * BN_SCALE, b * BN_SCALE

    w1, b1 = raw["fc1"]
    wr1a, br1a = fold_bn(*raw["res1.fc1"])
    wr1b, br1b = fold_bn(*raw["res1.fc2"])
    w21, b21 = raw["fc21"]
    w22, b22 = raw["fc22"]
    wh = jnp.concatenate([w21, w22], axis=1)     # fused mu|logvar head
    bh = jnp.concatenate([b21, b22], axis=1)
    w3, b3 = raw["fc3"]
    wr2a, br2a = fold_bn(*raw["res2.fc1"])
    wr2b, br2b = fold_bn(*raw["res2.fc2"])
    w4, b4 = raw["fc4"]

    pairs = [(w1, b1), (wr1a, br1a), (wr1b, br1b), (wh, bh),
             (w3, b3), (wr2a, br2a), (wr2b, br2b), (w4, b4)]
    # bf16 weights (halve DMA / VMEM, 2x MXU rate on v6e/v7x); f32 biases.
    return [(w.astype(jnp.bfloat16), b.astype(jnp.float32)) for w, b in pairs]


# --------------------------------------------------------------------------
# Wrapper
# --------------------------------------------------------------------------
def _pick_block_m(batch, requested):
    """Largest divisor of `batch` that is <= requested (prefer multiples of 8)."""
    requested = max(1, min(requested, batch))
    best = batch
    for cand in range(requested, 0, -1):
        if batch % cand == 0:
            best = cand
            break
    return best


def vae_forward(x, eps, prepped, *, block_m=128):
    batch, input_dim = x.shape
    latent_dim = eps.shape[1]
    hidden_dim = prepped[0][0].shape[1]
    out_width = input_dim + 2 * latent_dim

    block_m = _pick_block_m(batch, block_m)
    grid = (batch // block_m,)

    flat = []
    for w, b in prepped:
        flat += [w, b]

    def act_spec(d):
        return pl.BlockSpec((block_m, d), lambda i: (i, 0))

    def resident_spec(shape):
        # constant index_map -> weights stay resident in VMEM across grid steps
        return pl.BlockSpec(shape, lambda i: (0, 0))

    in_specs = [act_spec(input_dim), act_spec(latent_dim)]
    in_specs += [resident_spec(t.shape) for t in flat]
    out_specs = pl.BlockSpec((block_m, out_width), lambda i: (i, 0))

    # Explicit VMEM budget: resident weights (+ buffering headroom),
    # double-buffered activation tiles, fused-intermediate slack.
    w_bytes = sum(int(np.prod(t.shape)) * t.dtype.itemsize for t in flat)
    act_bytes = 2 * 4 * block_m * (input_dim + latent_dim + out_width)
    scratch_bytes = 16 * block_m * hidden_dim * 4
    vmem_limit = 2 * w_bytes + act_bytes + scratch_bytes + (4 << 20)
    vmem_limit = int(min(max(vmem_limit, 32 << 20), 64 << 20))

    kernel = _make_kernel(input_dim, latent_dim)
    packed = pl.pallas_call(
        kernel,
        out_shape=jax.ShapeDtypeStruct((batch, out_width), jnp.float32),
        grid_spec=pltpu.PrefetchScalarGridSpec(
            num_scalar_prefetch=0,
            grid=grid,
            in_specs=in_specs,
            out_specs=out_specs,
        ),
        compiler_params=pltpu.CompilerParams(
            dimension_semantics=("parallel",),   # shard batch tiles across TCs (v7x)
            vmem_limit_bytes=vmem_limit,
        ),
    )(x, eps, *flat)

    dec = packed[:, :input_dim]
    mu = packed[:, input_dim:input_dim + latent_dim]
    logvar = packed[:, input_dim + latent_dim:]
    return dec, mu, logvar


# --------------------------------------------------------------------------
# References (for correctness checks)
# --------------------------------------------------------------------------
def reference_bf16(x, eps, prepped):
    """Pure-JAX reference emulating the kernel numerics (bf16 matmul inputs,
    f32 accumulation) with the same prepped params."""
    def lin(a, w, b):
        return (a.astype(jnp.bfloat16).astype(jnp.float32)
                @ w.astype(jnp.float32)) + b

    def res(a, wa, ba, wb, bb):
        out = jnp.maximum(lin(a, wa, ba), 0.0)
        out = lin(out, wb, bb)
        return jnp.maximum(out + a, 0.0)

    ((w1, b1), (wr1a, br1a), (wr1b, br1b), (wh, bh),
     (w3, b3), (wr2a, br2a), (wr2b, br2b), (w4, b4)) = prepped
    L = eps.shape[1]
    h = lin(x, w1, b1)
    h = res(h, wr1a, br1a, wr1b, br1b)
    ml = lin(h, wh, bh)
    mu, logvar = ml[:, :L], ml[:, L:]
    z = mu + eps * jnp.exp(0.5 * logvar)
    d = lin(z, w3, b3)
    d = res(d, wr2a, br2a, wr2b, br2b)
    d = lin(d, w4, b4)
    return d, mu, logvar


def reference_f32(x, eps, raw):
    """Original TransformerVAE (eval mode) semantics, all-f32, unfused params."""
    def lin(a, p):
        return a @ p[0] + p[1]

    def res(a, pa, pb):
        out = jnp.maximum(lin(a, pa) * BN_SCALE, 0.0)
        out = lin(out, pb) * BN_SCALE
        return jnp.maximum(out + a, 0.0)

    h = lin(x, raw["fc1"])
    h = res(h, raw["res1.fc1"], raw["res1.fc2"])
    mu = lin(h, raw["fc21"])
    logvar = lin(h, raw["fc22"])
    z = mu + eps * jnp.exp(0.5 * logvar)
    d = lin(z, raw["fc3"])
    d = res(d, raw["res2.fc1"], raw["res2.fc2"])
    d = lin(d, raw["fc4"])
    return d, mu, logvar


# --------------------------------------------------------------------------
if __name__ == "__main__":
    input_dim, hidden_dim, latent_dim = 64, 128, 32
    batch = 32          # several batch tiles -> exercises the grid/pipeline path

    key = jax.random.PRNGKey(0)
    kx, keps, kp = jax.random.split(key, 3)
    x = jax.random.normal(kx, (batch, input_dim), jnp.float32)
    eps = jax.random.normal(keps, (batch, latent_dim), jnp.float32)

    raw = init_raw_params(kp, input_dim, hidden_dim, latent_dim)
    prepped = prep_params(raw)

    dec, mu, logvar = vae_forward(x, eps, prepped, block_m=8)
    jax.block_until_ready((dec, mu, logvar))

    assert dec.shape == (batch, input_dim)
    assert mu.shape == (batch, latent_dim)
    assert logvar.shape == (batch, latent_dim)

    # Tight check: kernel vs reference with identical (bf16) numerics.
    rd, rm, rl = reference_bf16(x, eps, prepped)
    np.testing.assert_allclose(np.asarray(dec), np.asarray(rd), rtol=1e-3, atol=1e-3)
    np.testing.assert_allclose(np.asarray(mu), np.asarray(rm), rtol=1e-3, atol=1e-3)
    np.testing.assert_allclose(np.asarray(logvar), np.asarray(rl), rtol=1e-3, atol=1e-3)

    # Structural check vs the original f32 module semantics (unfolded BN,
    # separate fc21/fc22); the only gap is bf16 weight/activation quantization.
    fd, fm, fl = reference_f32(x, eps, raw)
    np.testing.assert_allclose(np.asarray(dec), np.asarray(fd), rtol=0.1, atol=0.1)
    np.testing.assert_allclose(np.asarray(mu), np.asarray(fm), rtol=0.1, atol=0.1)
    np.testing.assert_allclose(np.asarray(logvar), np.asarray(fl), rtol=0.1, atol=0.1)

    # Full-batch (single-block) path as well.
    dec1, mu1, lv1 = vae_forward(x, eps, prepped, block_m=128)
    jax.block_until_ready((dec1, mu1, lv1))
    np.testing.assert_allclose(np.asarray(dec1), np.asarray(dec), rtol=1e-5, atol=1e-5)

    print("KERNEL_OK")
</pallas_src>

<mosaic_0001>
module attributes {stable_mosaic.version = 11 : i64} {
  func.func @kernel(%arg0: i32, %arg1: memref<8x64xf32, #tpu.memory_space<vmem>>, %arg2: memref<8x32xf32, #tpu.memory_space<vmem>>, %arg3: memref<64x128xbf16, #tpu.memory_space<vmem>>, %arg4: memref<1x128xf32, #tpu.memory_space<vmem>>, %arg5: memref<128x128xbf16, #tpu.memory_space<vmem>>, %arg6: memref<1x128xf32, #tpu.memory_space<vmem>>, %arg7: memref<128x128xbf16, #tpu.memory_space<vmem>>, %arg8: memref<1x128xf32, #tpu.memory_space<vmem>>, %arg9: memref<128x64xbf16, #tpu.memory_space<vmem>>, %arg10: memref<1x64xf32, #tpu.memory_space<vmem>>, %arg11: memref<32x128xbf16, #tpu.memory_space<vmem>>, %arg12: memref<1x128xf32, #tpu.memory_space<vmem>>, %arg13: memref<128x128xbf16, #tpu.memory_space<vmem>>, %arg14: memref<1x128xf32, #tpu.memory_space<vmem>>, %arg15: memref<128x128xbf16, #tpu.memory_space<vmem>>, %arg16: memref<1x128xf32, #tpu.memory_space<vmem>>, %arg17: memref<128x64xbf16, #tpu.memory_space<vmem>>, %arg18: memref<1x64xf32, #tpu.memory_space<vmem>>, %arg19: memref<8x128xf32, #tpu.memory_space<vmem>>) attributes {dimension_semantics = [#tpu.dimension_semantics<parallel>], iteration_bounds = array<i64: 4>, scalar_prefetch = 0 : i64, scratch_operands = 0 : i64, tpu.core_type = #tpu.core_type<tc>, window_params = [{transform_indices = @transform_0, window_bounds = array<i64: 8, 64>}, {transform_indices = @transform_1, window_bounds = array<i64: 8, 32>}, {pipeline_mode = #tpu.pipeline_mode<synchronous>, transform_indices = @transform_2, window_bounds = array<i64: 64, 128>}, {pipeline_mode = #tpu.pipeline_mode<synchronous>, transform_indices = @transform_3, window_bounds = array<i64: 1, 128>}, {pipeline_mode = #tpu.pipeline_mode<synchronous>, transform_indices = @transform_4, window_bounds = array<i64: 128, 128>}, {pipeline_mode = #tpu.pipeline_mode<synchronous>, transform_indices = @transform_5, window_bounds = array<i64: 1, 128>}, {pipeline_mode = #tpu.pipeline_mode<synchronous>, transform_indices = @transform_6, window_bounds = array<i64: 128, 128>}, {pipeline_mode = #tpu.pipeline_mode<synchronous>, transform_indices = @transform_7, window_bounds = array<i64: 1, 128>}, {pipeline_mode = #tpu.pipeline_mode<synchronous>, transform_indices = @transform_8, window_bounds = array<i64: 128, 64>}, {pipeline_mode = #tpu.pipeline_mode<synchronous>, transform_indices = @transform_9, window_bounds = array<i64: 1, 64>}, {pipeline_mode = #tpu.pipeline_mode<synchronous>, transform_indices = @transform_10, window_bounds = array<i64: 32, 128>}, {pipeline_mode = #tpu.pipeline_mode<synchronous>, transform_indices = @transform_11, window_bounds = array<i64: 1, 128>}, {pipeline_mode = #tpu.pipeline_mode<synchronous>, transform_indices = @transform_12, window_bounds = array<i64: 128, 128>}, {pipeline_mode = #tpu.pipeline_mode<synchronous>, transform_indices = @transform_13, window_bounds = array<i64: 1, 128>}, {pipeline_mode = #tpu.pipeline_mode<synchronous>, transform_indices = @transform_14, window_bounds = array<i64: 128, 128>}, {pipeline_mode = #tpu.pipeline_mode<synchronous>, transform_indices = @transform_15, window_bounds = array<i64: 1, 128>}, {pipeline_mode = #tpu.pipeline_mode<synchronous>, transform_indices = @transform_16, window_bounds = array<i64: 128, 64>}, {pipeline_mode = #tpu.pipeline_mode<synchronous>, transform_indices = @transform_17, window_bounds = array<i64: 1, 64>}, {transform_indices = @transform_18, window_bounds = array<i64: 8, 128>}]} {
    %c0 = arith.constant 0 : index
    %c0_0 = arith.constant 0 : index
    %0 = vector.load %arg1[%c0, %c0_0] : memref<8x64xf32, #tpu.memory_space<vmem>>, vector<8x64xf32>
    %1 = arith.truncf %0 : vector<8x64xf32> to vector<8x64xbf16>
    %c0_1 = arith.constant 0 : index
    %c0_2 = arith.constant 0 : index
    %2 = vector.load %arg3[%c0_1, %c0_2] : memref<64x128xbf16, #tpu.memory_space<vmem>>, vector<64x128xbf16>
    %cst = arith.constant dense<0.000000e+00> : vector<8x128xf32>
    %3 = tpu.matmul %1, %2, %cst {dimension_numbers = #tpu.dot_dimension_numbers<[1], [0], [0], [1], [0, 0, 1, 1], [], []>} : vector<8x64xbf16>, vector<64x128xbf16>, vector<8x128xf32> -> vector<8x128xf32>
    %c0_3 = arith.constant 0 : index
    %c0_4 = arith.constant 0 : index
    %4 = vector.load %arg4[%c0_3, %c0_4] : memref<1x128xf32, #tpu.memory_space<vmem>>, vector<1x128xf32>
    %5 = vector.broadcast %4 : vector<1x128xf32> to vector<8x128xf32>
    %6 = arith.addf %3, %5 : vector<8x128xf32>
    %7 = arith.truncf %6 : vector<8x128xf32> to vector<8x128xbf16>
    %c0_5 = arith.constant 0 : index
    %c0_6 = arith.constant 0 : index
    %8 = vector.load %arg5[%c0_5, %c0_6] : memref<128x128xbf16, #tpu.memory_space<vmem>>, vector<128x128xbf16>
    %cst_7 = arith.constant dense<0.000000e+00> : vector<8x128xf32>
    %9 = tpu.matmul %7, %8, %cst_7 {dimension_numbers = #tpu.dot_dimension_numbers<[1], [0], [0], [1], [0, 0, 1, 1], [], []>} : vector<8x128xbf16>, vector<128x128xbf16>, vector<8x128xf32> -> vector<8x128xf32>
    %c0_8 = arith.constant 0 : index
    %c0_9 = arith.constant 0 : index
    %10 = vector.load %arg6[%c0_8, %c0_9] : memref<1x128xf32, #tpu.memory_space<vmem>>, vector<1x128xf32>
    %11 = vector.broadcast %10 : vector<1x128xf32> to vector<8x128xf32>
    %12 = arith.addf %9, %11 : vector<8x128xf32>
    %cst_10 = arith.constant 0.000000e+00 : f32
    %13 = vector.broadcast %cst_10 : f32 to vector<8x128xf32>
    %14 = arith.maximumf %12, %13 : vector<8x128xf32>
    %15 = arith.truncf %14 : vector<8x128xf32> to vector<8x128xbf16>
    %c0_11 = arith.constant 0 : index
    %c0_12 = arith.constant 0 : index
    %16 = vector.load %arg7[%c0_11, %c0_12] : memref<128x128xbf16, #tpu.memory_space<vmem>>, vector<128x128xbf16>
    %cst_13 = arith.constant dense<0.000000e+00> : vector<8x128xf32>
    %17 = tpu.matmul %15, %16, %cst_13 {dimension_numbers = #tpu.dot_dimension_numbers<[1], [0], [0], [1], [0, 0, 1, 1], [], []>} : vector<8x128xbf16>, vector<128x128xbf16>, vector<8x128xf32> -> vector<8x128xf32>
    %c0_14 = arith.constant 0 : index
    %c0_15 = arith.constant 0 : index
    %18 = vector.load %arg8[%c0_14, %c0_15] : memref<1x128xf32, #tpu.memory_space<vmem>>, vector<1x128xf32>
    %19 = vector.broadcast %18 : vector<1x128xf32> to vector<8x128xf32>
    %20 = arith.addf %17, %19 : vector<8x128xf32>
    %21 = arith.addf %20, %6 : vector<8x128xf32>
    %cst_16 = arith.constant 0.000000e+00 : f32
    %22 = vector.broadcast %cst_16 : f32 to vector<8x128xf32>
    %23 = arith.maximumf %21, %22 : vector<8x128xf32>
    %24 = arith.truncf %23 : vector<8x128xf32> to vector<8x128xbf16>
    %c0_17 = arith.constant 0 : index
    %c0_18 = arith.constant 0 : index
    %25 = vector.load %arg9[%c0_17, %c0_18] : memref<128x64xbf16, #tpu.memory_space<vmem>>, vector<128x64xbf16>
    %cst_19 = arith.constant dense<0.000000e+00> : vector<8x64xf32>
    %26 = tpu.matmul %24, %25, %cst_19 {dimension_numbers = #tpu.dot_dimension_numbers<[1], [0], [0], [1], [0, 0, 1, 1], [], []>} : vector<8x128xbf16>, vector<128x64xbf16>, vector<8x64xf32> -> vector<8x64xf32>
    %c0_20 = arith.constant 0 : index
    %c0_21 = arith.constant 0 : index
    %27 = vector.load %arg10[%c0_20, %c0_21] : memref<1x64xf32, #tpu.memory_space<vmem>>, vector<1x64xf32>
    %28 = vector.broadcast %27 : vector<1x64xf32> to vector<8x64xf32>
    %29 = arith.addf %26, %28 : vector<8x64xf32>
    %30 = vector.extract_strided_slice %29 {offsets = [0, 0], sizes = [8, 32], strides = [1, 1]} : vector<8x64xf32> to vector<8x32xf32>
    %31 = vector.extract_strided_slice %29 {offsets = [0, 32], sizes = [8, 32], strides = [1, 1]} : vector<8x64xf32> to vector<8x32xf32>
    %c0_22 = arith.constant 0 : index
    %c0_23 = arith.constant 0 : index
    %32 = vector.load %arg2[%c0_22, %c0_23] : memref<8x32xf32, #tpu.memory_space<vmem>>, vector<8x32xf32>
    %cst_24 = arith.constant 5.000000e-01 : f32
    %33 = vector.broadcast %cst_24 : f32 to vector<8x32xf32>
    %34 = arith.mulf %33, %31 : vector<8x32xf32>
    %35 = math.exp %34 : vector<8x32xf32>
    %36 = arith.mulf %32, %35 : vector<8x32xf32>
    %37 = arith.addf %30, %36 : vector<8x32xf32>
    %38 = arith.truncf %37 : vector<8x32xf32> to vector<8x32xbf16>
    %c0_25 = arith.constant 0 : index
    %c0_26 = arith.constant 0 : index
    %39 = vector.load %arg11[%c0_25, %c0_26] : memref<32x128xbf16, #tpu.memory_space<vmem>>, vector<32x128xbf16>
    %cst_27 = arith.constant dense<0.000000e+00> : vector<8x128xf32>
    %40 = tpu.matmul %38, %39, %cst_27 {dimension_numbers = #tpu.dot_dimension_numbers<[1], [0], [0], [1], [0, 0, 1, 1], [], []>} : vector<8x32xbf16>, vector<32x128xbf16>, vector<8x128xf32> -> vector<8x128xf32>
    %c0_28 = arith.constant 0 : index
    %c0_29 = arith.constant 0 : index
    %41 = vector.load %arg12[%c0_28, %c0_29] : memref<1x128xf32, #tpu.memory_space<vmem>>, vector<1x128xf32>
    %42 = vector.broadcast %41 : vector<1x128xf32> to vector<8x128xf32>
    %43 = arith.addf %40, %42 : vector<8x128xf32>
    %44 = arith.truncf %43 : vector<8x128xf32> to vector<8x128xbf16>
    %c0_30 = arith.constant 0 : index
    %c0_31 = arith.constant 0 : index
    %45 = vector.load %arg13[%c0_30, %c0_31] : memref<128x128xbf16, #tpu.memory_space<vmem>>, vector<128x128xbf16>
    %cst_32 = arith.constant dense<0.000000e+00> : vector<8x128xf32>
    %46 = tpu.matmul %44, %45, %cst_32 {dimension_numbers = #tpu.dot_dimension_numbers<[1], [0], [0], [1], [0, 0, 1, 1], [], []>} : vector<8x128xbf16>, vector<128x128xbf16>, vector<8x128xf32> -> vector<8x128xf32>
    %c0_33 = arith.constant 0 : index
    %c0_34 = arith.constant 0 : index
    %47 = vector.load %arg14[%c0_33, %c0_34] : memref<1x128xf32, #tpu.memory_space<vmem>>, vector<1x128xf32>
    %48 = vector.broadcast %47 : vector<1x128xf32> to vector<8x128xf32>
    %49 = arith.addf %46, %48 : vector<8x128xf32>
    %cst_35 = arith.constant 0.000000e+00 : f32
    %50 = vector.broadcast %cst_35 : f32 to vector<8x128xf32>
    %51 = arith.maximumf %49, %50 : vector<8x128xf32>
    %52 = arith.truncf %51 : vector<8x128xf32> to vector<8x128xbf16>
    %c0_36 = arith.constant 0 : index
    %c0_37 = arith.constant 0 : index
    %53 = vector.load %arg15[%c0_36, %c0_37] : memref<128x128xbf16, #tpu.memory_space<vmem>>, vector<128x128xbf16>
    %cst_38 = arith.constant dense<0.000000e+00> : vector<8x128xf32>
    %54 = tpu.matmul %52, %53, %cst_38 {dimension_numbers = #tpu.dot_dimension_numbers<[1], [0], [0], [1], [0, 0, 1, 1], [], []>} : vector<8x128xbf16>, vector<128x128xbf16>, vector<8x128xf32> -> vector<8x128xf32>
    %c0_39 = arith.constant 0 : index
    %c0_40 = arith.constant 0 : index
    %55 = vector.load %arg16[%c0_39, %c0_40] : memref<1x128xf32, #tpu.memory_space<vmem>>, vector<1x128xf32>
    %56 = vector.broadcast %55 : vector<1x128xf32> to vector<8x128xf32>
    %57 = arith.addf %54, %56 : vector<8x128xf32>
    %58 = arith.addf %57, %43 : vector<8x128xf32>
    %cst_41 = arith.constant 0.000000e+00 : f32
    %59 = vector.broadcast %cst_41 : f32 to vector<8x128xf32>
    %60 = arith.maximumf %58, %59 : vector<8x128xf32>
    %61 = arith.truncf %60 : vector<8x128xf32> to vector<8x128xbf16>
    %c0_42 = arith.constant 0 : index
    %c0_43 = arith.constant 0 : index
    %62 = vector.load %arg17[%c0_42, %c0_43] : memref<128x64xbf16, #tpu.memory_space<vmem>>, vector<128x64xbf16>
    %cst_44 = arith.constant dense<0.000000e+00> : vector<8x64xf32>
    %63 = tpu.matmul %61, %62, %cst_44 {dimension_numbers = #tpu.dot_dimension_numbers<[1], [0], [0], [1], [0, 0, 1, 1], [], []>} : vector<8x128xbf16>, vector<128x64xbf16>, vector<8x64xf32> -> vector<8x64xf32>
    %c0_45 = arith.constant 0 : index
    %c0_46 = arith.constant 0 : index
    %64 = vector.load %arg18[%c0_45, %c0_46] : memref<1x64xf32, #tpu.memory_space<vmem>>, vector<1x64xf32>
    %65 = vector.broadcast %64 : vector<1x64xf32> to vector<8x64xf32>
    %66 = arith.addf %63, %65 : vector<8x64xf32>
    %67 = tpu.concatenate %66, %30, %31 in 1 : vector<8x64xf32>, vector<8x32xf32>, vector<8x32xf32> -> vector<8x128xf32>
    %c0_47 = arith.constant 0 : index
    %c0_48 = arith.constant 0 : index
    %68 = vector.load %arg19[%c0_47, %c0_48] : memref<8x128xf32, #tpu.memory_space<vmem>>, vector<8x128xf32>
    tpu.vector_store %arg19[%c0_47, %c0_48], %67 {strides = array<i32>} : memref<8x128xf32, #tpu.memory_space<vmem>>, vector<8x128xf32>,
    return
  }
  func.func @transform_0(%arg0: i32) -> (i32, i32) {
    %c0_i32 = arith.constant 0 : i32
    %c0_i32_0 = arith.constant 0 : i32
    return %arg0, %c0_i32 : i32, i32
  }
  func.func @transform_1(%arg0: i32) -> (i32, i32) {
    %c0_i32 = arith.constant 0 : i32
    %c0_i32_0 = arith.constant 0 : i32
    return %arg0, %c0_i32 : i32, i32
  }
  func.func @transform_2(%arg0: i32) -> (i32, i32) {
    %c0_i32 = arith.constant 0 : i32
    %c0_i32_0 = arith.constant 0 : i32
    %c0_i32_1 = arith.constant 0 : i32
    return %c0_i32, %c0_i32_0 : i32, i32
  }
  func.func @transform_3(%arg0: i32) -> (i32, i32) {
    %c0_i32 = arith.constant 0 : i32
    %c0_i32_0 = arith.constant 0 : i32
    %c0_i32_1 = arith.constant 0 : i32
    return %c0_i32, %c0_i32_0 : i32, i32
  }
  func.func @transform_4(%arg0: i32) -> (i32, i32) {
    %c0_i32 = arith.constant 0 : i32
    %c0_i32_0 = arith.constant 0 : i32
    %c0_i32_1 = arith.constant 0 : i32
    return %c0_i32, %c0_i32_0 : i32, i32
  }
  func.func @transform_5(%arg0: i32) -> (i32, i32) {
    %c0_i32 = arith.constant 0 : i32
    %c0_i32_0 = arith.constant 0 : i32
    %c0_i32_1 = arith.constant 0 : i32
    return %c0_i32, %c0_i32_0 : i32, i32
  }
  func.func @transform_6(%arg0: i32) -> (i32, i32) {
    %c0_i32 = arith.constant 0 : i32
    %c0_i32_0 = arith.constant 0 : i32
    %c0_i32_1 = arith.constant 0 : i32
    return %c0_i32, %c0_i32_0 : i32, i32
  }
  func.func @transform_7(%arg0: i32) -> (i32, i32) {
    %c0_i32 = arith.constant 0 : i32
    %c0_i32_0 = arith.constant 0 : i32
    %c0_i32_1 = arith.constant 0 : i32
    return %c0_i32, %c0_i32_0 : i32, i32
  }
  func.func @transform_8(%arg0: i32) -> (i32, i32) {
    %c0_i32 = arith.constant 0 : i32
    %c0_i32_0 = arith.constant 0 : i32
    %c0_i32_1 = arith.constant 0 : i32
    return %c0_i32, %c0_i32_0 : i32, i32
  }
  func.func @transform_9(%arg0: i32) -> (i32, i32) {
    %c0_i32 = arith.constant 0 : i32
    %c0_i32_0 = arith.constant 0 : i32
    %c0_i32_1 = arith.constant 0 : i32
    return %c0_i32, %c0_i32_0 : i32, i32
  }
  func.func @transform_10(%arg0: i32) -> (i32, i32) {
    %c0_i32 = arith.constant 0 : i32
    %c0_i32_0 = arith.constant 0 : i32
    %c0_i32_1 = arith.constant 0 : i32
    return %c0_i32, %c0_i32_0 : i32, i32
  }
  func.func @transform_11(%arg0: i32) -> (i32, i32) {
    %c0_i32 = arith.constant 0 : i32
    %c0_i32_0 = arith.constant 0 : i32
    %c0_i32_1 = arith.constant 0 : i32
    return %c0_i32, %c0_i32_0 : i32, i32
  }
  func.func @transform_12(%arg0: i32) -> (i32, i32) {
    %c0_i32 = arith.constant 0 : i32
    %c0_i32_0 = arith.constant 0 : i32
    %c0_i32_1 = arith.constant 0 : i32
    return %c0_i32, %c0_i32_0 : i32, i32
  }
  func.func @transform_13(%arg0: i32) -> (i32, i32) {
    %c0_i32 = arith.constant 0 : i32
    %c0_i32_0 = arith.constant 0 : i32
    %c0_i32_1 = arith.constant 0 : i32
    return %c0_i32, %c0_i32_0 : i32, i32
  }
  func.func @transform_14(%arg0: i32) -> (i32, i32) {
    %c0_i32 = arith.constant 0 : i32
    %c0_i32_0 = arith.constant 0 : i32
    %c0_i32_1 = arith.constant 0 : i32
    return %c0_i32, %c0_i32_0 : i32, i32
  }
  func.func @transform_15(%arg0: i32) -> (i32, i32) {
    %c0_i32 = arith.constant 0 : i32
    %c0_i32_0 = arith.constant 0 : i32
    %c0_i32_1 = arith.constant 0 : i32
    return %c0_i32, %c0_i32_0 : i32, i32
  }
  func.func @transform_16(%arg0: i32) -> (i32, i32) {
    %c0_i32 = arith.constant 0 : i32
    %c0_i32_0 = arith.constant 0 : i32
    %c0_i32_1 = arith.constant 0 : i32
    return %c0_i32, %c0_i32_0 : i32, i32
  }
  func.func @transform_17(%arg0: i32) -> (i32, i32) {
    %c0_i32 = arith.constant 0 : i32
    %c0_i32_0 = arith.constant 0 : i32
    %c0_i32_1 = arith.constant 0 : i32
    return %c0_i32, %c0_i32_0 : i32, i32
  }
  func.func @transform_18(%arg0: i32) -> (i32, i32) {
    %c0_i32 = arith.constant 0 : i32
    %c0_i32_0 = arith.constant 0 : i32
    return %arg0, %c0_i32 : i32, i32
  }
}

</mosaic_0001>

<bundles_post_ra>
// kernel: tpu_custom_call.1
= control target key start
LH: loop header
LB: loop body
LE: loop exit
PB: predicated region body
PF: predicated region fallthrough
CT: control target
= control target key end

     0   :  { %s3103_s0 = inlined_call_operand.hbm [shape: f32[32,64], index: 0, kind: input, shape index: {}]   ;;  %s3104_s1 = inlined_call_operand.hbm [shape: f32[32,32], index: 1, kind: input, shape index: {}]   ;;  %s3105_s2 = inlined_call_operand.hbm [shape: bf16[64,128], index: 2, kind: input, shape index: {}]   ;;  %s3106_s3 = inlined_call_operand.vmem [shape: f32[1,128], index: 3, kind: input, shape index: {}]   ;;  %s3107_s4 = inlined_call_operand.vmem [shape: bf16[128,128], index: 4, kind: input, shape index: {}]   ;;  %s3108_s5 = inlined_call_operand.vmem [shape: f32[1,128], index: 5, kind: input, shape index: {}]   ;;  %s3109_s6 = inlined_call_operand.vmem [shape: bf16[128,128], index: 6, kind: input, shape index: {}]   ;;  %s3110_s7 = inlined_call_operand.hbm [shape: f32[1,128], index: 7, kind: input, shape index: {}]   ;;  %s3111_s8 = inlined_call_operand.vmem [shape: bf16[128,64], index: 8, kind: input, shape index: {}]   ;;  %s3112_s9 = inlined_call_operand.hbm [shape: f32[1,64], index: 9, kind: input, shape index: {}]   ;;  %s3113_s10 = inlined_call_operand.hbm [shape: bf16[32,128], index: 10, kind: input, shape index: {}]   ;;  %s3114_s11 = inlined_call_operand.vmem [shape: f32[1,128], index: 11, kind: input, shape index: {}]   ;;  %s3115_s12 = inlined_call_operand.vmem [shape: bf16[128,128], index: 12, kind: input, shape index: {}]   ;;  %s3116_s13 = inlined_call_operand.vmem [shape: f32[1,128], index: 13, kind: input, shape index: {}]   ;;  %s3117_s14 = inlined_call_operand.hbm [shape: bf16[128,128], index: 14, kind: input, shape index: {}]   ;;  %s3118_s15 = inlined_call_operand.vmem [shape: f32[1,128], index: 15, kind: input, shape index: {}]   ;;  %s3119_s16 = inlined_call_operand.vmem [shape: bf16[128,64], index: 16, kind: input, shape index: {}]   ;;  %s3120_s17 = inlined_call_operand.vmem [shape: f32[1,64], index: 17, kind: input, shape index: {}]   ;;  %s3121_s18 = inlined_call_operand.hbm [shape: f32[32,128], index: 18, kind: output, shape index: {}]  }
   0x1   :  { %3134 = sst [smem:[#allocation23_spill]] %s3103_s0 }
   0x2   :  { %3135 = sst [smem:[#allocation24_spill]] %s3104_s1 }
   0x3   :  { %3136 = sst [smem:[#allocation25_spill]] %s3105_s2 }
   0x4   :  { %3137 = sst [smem:[#allocation26_spill]] %s3108_s5 }
   0x5   :  { %3138 = sst [smem:[#allocation27_spill]] %s3110_s7 }
   0x6   :  { %3139 = sst [smem:[#allocation28_spill]] %s3112_s9 }
   0x7   :  { %3140 = sst [smem:[#allocation29_spill]] %s3113_s10 }
   0x8   :  { %3141 = sst [smem:[#allocation30_spill]] %s3114_s11 }
   0x9   :  { %3142 = sst [smem:[#allocation31_spill]] %s3115_s12 }
   0xa   :  { %3143 = sst [smem:[#allocation32_spill]] %s3116_s13 }
   0xb   :  { %3144 = sst [smem:[#allocation33_spill]] %s3117_s14 }
   0xc   :  { %3145 = sst [smem:[#allocation34_spill]] %s3118_s15 }
   0xd   :  { %3146 = sst [smem:[#allocation35_spill]] %s3119_s16 }
   0xe   :  { %3147 = sst [smem:[#allocation36_spill]] %s3120_s17 }
   0xf   :  { %3148 = sst [smem:[#allocation37_spill]] %s3121_s18 }
  0x10   :  { %23 = vsyncpa [#allocation3], 0 }
  0x11   :  { %25 = vsyncpa [#allocation3 + $0x1], 0 }
  0x12   :  { %26 = vsyncpa [#allocation6], 0 }
  0x13   :  { %28 = vsyncpa [#allocation6 + $0x1], 0 }
  0x14   :  { %29 = vsyncpa [#allocation9], 0 }
  0x15   :  { %30 = vsyncpa [#allocation12], 0 }
  0x16   :  { %31 = vsyncpa [#allocation4], 0 }
  0x17   :  { %33 = vsyncpa [#allocation4 + $0x1], 0  ;;  %s2548_s27 = smov 0   ;;  %s2550_s28 = smov 0  }
  0x18   :  { %s2552_s29 = smov 0   ;;  %s2554_s30 = smov 0  }
  0x19 LB: > { %3149 = sst [smem:[#allocation21_spill]] %s2433_s29  ;;  %s2439_s0 = smov [#allocation7]   ;;  %s2437_s30 = sphi %s2554_s30, %s3188_s30   ;;  %s2433_s29 = sphi %s2552_s29, %s3185_s29   ;;  %s2429_s28 = sphi %s2550_s28, %s3187_s28   ;;  %s2425_s27 = sphi %s2548_s27, %s3186_s27  }
  0x1a   : > { %s470_s19 = sshll.u32 %s2439_s0, 4  ;;  %s2569_s1 = sadd.s32 4294967295, %s2437_s30   ;;  %s2574_s19 = int_to_ptr.vmem [resolvable:$true] %s470_s19 }
  0x1b   : > { %p1701_p0 = scmp.ge.s32.totalorder %s2437_s30, 1  ;;  %p3129_p1 = scmp.eq.s32.totalorder %s2569_s1, 0 }
  0x1c   : > { %p458_p2 = scmp.lt.s32.totalorder %s2437_s30, 5  ;;  %s2440_s21 = smov [#allocation8]  }
  0x1d   : > { %s496_s22 = sshll.u32 %s2440_s21, 4  ;;  %s2441_s23 = smov [#allocation11]   ;;  %s2588_s22 = int_to_ptr.vmem [resolvable:$true] %s496_s22 }
  0x1e   : > { %p2576_p3 = pnand %p1701_p0, %p458_p2  ;;  %s520_s24 = sshll.u32 %s2441_s23, 4  ;;  %s2590_s24 = int_to_ptr.vmem [resolvable:$true] %s520_s24 }
  0x1f   : > { %s3152_s0 = sld [smem:[#allocation25_spill]] }
  0x20   : > { %s3150_s20 = scalar_select %p2576_p3, 1, 0 }
  0x21   : > { %p2017_p4 = pneg %p2576_p3 }
  0x23   : > { %p2584_p5 = pnand %p2017_p4, %p3129_p1 }
  0x25   : > { %s2155_s18 = scalar_lea.hbm %s3152_s0, 512  ;;  %p2600_p7 = pneg %p2584_p5 }
  0x26   : > { %p2156_p6 = scmp.ne.s32.totalorder %s3152_s0, %s2155_s18  ;;  %p2162_p10 = scmp.lt.u32.totalorder %s2155_s18, %s3152_s0 }
  0x28   : > { %p2158_p8 = pnand %p2600_p7, %p2156_p6 }
  0x2a   : > { %p2159_p9 = pneg %p2158_p8 }
  0x2c   : > { %p2164_p11 = pnand %p2162_p10, %p2159_p9 }
  0x2e   : > { %2167 = shalt.err (!%p2164_p11)
}
  0x2f   : > { %s2168_s15 = scalar_lea.vmem %s2574_s19, 512  ;;  %p2176_p2 = scmp.lt.s32.totalorder %s2574_s19, %s2574_s19 }
  0x30   : > { %p2169_p12 = scmp.ne.s32.totalorder %s2574_s19, %s2168_s15  ;;  %p2177_p4 = scmp.lt.s32.totalorder %s2168_s15, %s2168_s15 }
  0x32   : > { %p2171_p13 = pnand %p2169_p12, %p2600_p7  ;;  %p2178_p6 = por %p2177_p4, %p2176_p2 }
  0x34   : > { %p2172_p0 = pneg %p2171_p13 }
  0x36   : > { %p2179_p8 = pnand %p2178_p6, %p2172_p0 }
  0x38   : > { %2182 = shalt.err (!%p2179_p8)
}
  0x39   : > { %s2442_s17 = smov 64   ;;  %s2443_s13 = smov 4  }
  0x3a   : > { %2020 = dma.hbm_to_vmem [thread:$0]  (!%p2584_p5), %s3152_s0, 512, %s2574_s19, [#allocation6], %s2442_s17, %s2442_s17, %s2443_s13  }
  0x3b   : > { %s3154_s7 = sld [smem:[#allocation27_spill]] }
  0x41   : > { %s2183_s15 = scalar_lea.hbm %s3154_s7, 16 }
  0x42   : > { %p2184_p9 = scmp.ne.s32.totalorder %s3154_s7, %s2183_s15  ;;  %p2190_p12 = scmp.lt.u32.totalorder %s2183_s15, %s3154_s7 }
  0x44   : > { %p2186_p10 = pnand %p2184_p9, %p2600_p7 }
  0x46   : > { %p2187_p11 = pneg %p2186_p10 }
  0x48   : > { %p2192_p13 = pnand %p2190_p12, %p2187_p11 }
  0x4a   : > { %2195 = shalt.err (!%p2192_p13)
}
  0x4b   : > { %s2196_s19 = scalar_lea.vmem %s2588_s22, 16  ;;  %s2203_s11 = scalar_lea.vmem %s2588_s22, 32 }
  0x4c   : > { %p2197_p0 = scmp.ne.s32.totalorder %s2588_s22, %s2196_s19  ;;  %p2204_p6 = scmp.lt.s32.totalorder %s2588_s22, %s2588_s22 }
  0x4d   : > { %p2205_p8 = scmp.lt.s32.totalorder %s2203_s11, %s2196_s19 }
  0x4e   : > { %p2199_p2 = pnand %p2197_p0, %p2600_p7 }
  0x4f   : > { %p2206_p9 = por %p2205_p8, %p2204_p6 }
  0x50   : > { %p2200_p4 = pneg %p2199_p2 }
  0x52   : > { %p2207_p10 = pnand %p2206_p9, %p2200_p4 }
  0x54   : > { %2210 = shalt.err (!%p2207_p10)
}
  0x55   : > { %2023 = dma.hbm_to_vmem [thread:$0]  (!%p2584_p5), %s3154_s7, 16, %s2588_s22, [#allocation9]  }
  0x56   : > { %s3155_s10 = sld [smem:[#allocation29_spill]] }
  0x5c   : > { %s2211_s25 = scalar_lea.hbm %s3155_s10, 256 }
  0x5d   : > { %p2212_p11 = scmp.ne.s32.totalorder %s3155_s10, %s2211_s25  ;;  %p2218_p0 = scmp.lt.u32.totalorder %s2211_s25, %s3155_s10 }
  0x5f   : > { %p2214_p12 = pnand %p2212_p11, %p2600_p7 }
  0x61   : > { %p2215_p13 = pneg %p2214_p12 }
  0x63   : > { %p2220_p2 = pnand %p2218_p0, %p2215_p13 }
  0x65   : > { %2223 = shalt.err (!%p2220_p2)
}
  0x66   : > { %s2224_s22 = scalar_lea.vmem %s2590_s24, 256  ;;  %p2232_p9 = scmp.lt.s32.totalorder %s2590_s24, %s2590_s24 }
  0x67   : > { %p2225_p4 = scmp.ne.s32.totalorder %s2590_s24, %s2224_s22  ;;  %p2233_p10 = scmp.lt.s32.totalorder %s2224_s22, %s2224_s22 }
  0x69   : > { %p2227_p6 = pnand %p2225_p4, %p2600_p7  ;;  %p2234_p11 = por %p2233_p10, %p2232_p9 }
  0x6b   : > { %p2228_p8 = pneg %p2227_p6 }
  0x6d   : > { %p2235_p12 = pnand %p2234_p11, %p2228_p8 }
  0x6f   : > { %2238 = shalt.err (!%p2235_p12)
}
  0x70   : > { %2029 = dma.hbm_to_vmem [thread:$0]  (!%p2584_p5), %s3155_s10, 256, %s2590_s24, [#allocation12], %s2442_s17, %s2442_s17, %s2443_s13  }
  0x71   : > { %s2444_s12 = smov [#allocation10]   ;;  %s2445_s18 = smov [#allocation13]  }
  0x72   : > { %s510_s16 = sshll.u32 %s2444_s12, 4  ;;  %s542_s25 = sshll.u32 %s2445_s18, 4  ;;  %s511_s16 = int_to_ptr.vmem [resolvable:$true] %s510_s16  ;;  %s543_s25 = int_to_ptr.vmem [resolvable:$true] %s542_s25 }
  0x73   : > { %s3156_s9 = sld [smem:[#allocation28_spill]] }
  0x79   : > { %s2239_s15 = scalar_lea.hbm %s3156_s9, 16 }
  0x7a   : > { %p2240_p13 = scmp.ne.s32.totalorder %s3156_s9, %s2239_s15  ;;  %p2246_p4 = scmp.lt.u32.totalorder %s2239_s15, %s3156_s9 }
  0x7c   : > { %p2242_p0 = pnand %p2240_p13, %p2600_p7 }
  0x7e   : > { %p2243_p2 = pneg %p2242_p0 }
  0x80   : > { %p2248_p6 = pnand %p2246_p4, %p2243_p2 }
  0x82   : > { %2251 = shalt.err (!%p2248_p6)
}
  0x83   : > { %s2252_s24 = scalar_lea.vmem %s511_s16, 16  ;;  %s2259_s5 = scalar_lea.vmem %s511_s16, 32 }
  0x84   : > { %p2253_p8 = scmp.ne.s32.totalorder %s511_s16, %s2252_s24  ;;  %p2260_p11 = scmp.lt.s32.totalorder %s511_s16, %s511_s16 }
  0x85   : > { %p2261_p12 = scmp.lt.s32.totalorder %s2259_s5, %s2252_s24 }
  0x86   : > { %p2255_p9 = pnand %p2253_p8, %p2600_p7 }
  0x87   : > { %p2262_p1 = por %p2261_p12, %p2260_p11 }
  0x88   : > { %p2256_p10 = pneg %p2255_p9 }
  0x8a   : > { %p2263_p3 = pnand %p2262_p1, %p2256_p10 }
  0x8c   : > { %2266 = shalt.err (!%p2263_p3)
}
  0x8d   : > { %2026 = dma.hbm_to_vmem [thread:$0]  (!%p2584_p5), %s3156_s9, 16, %s511_s16, [#allocation9]  }
  0x8e   : > { %s3157_s14 = sld [smem:[#allocation33_spill]] }
  0x94   : > { %s2267_s23 = scalar_lea.hbm %s3157_s14, 1024 }
  0x95   : > { %p2268_p13 = scmp.ne.s32.totalorder %s3157_s14, %s2267_s23  ;;  %p2274_p3 = scmp.lt.u32.totalorder %s2267_s23, %s3157_s14 }
  0x97   : > { %p2270_p0 = pnand %p2268_p13, %p2600_p7 }
  0x99   : > { %p2271_p1 = pneg %p2270_p0 }
  0x9b   : > { %p2276_p2 = pnand %p2274_p3, %p2271_p1 }
  0x9d   : > { %2279 = shalt.err (!%p2276_p2)
}
  0x9e   : > { %s2280_s24 = scalar_lea.vmem %s543_s25, 1024  ;;  %p2288_p9 = scmp.lt.s32.totalorder %s543_s25, %s543_s25 }
  0x9f   : > { %p2281_p4 = scmp.ne.s32.totalorder %s543_s25, %s2280_s24  ;;  %p2289_p10 = scmp.lt.s32.totalorder %s2280_s24, %s2280_s24 }
  0xa1   : > { %p2283_p6 = pnand %p2281_p4, %p2600_p7  ;;  %p2290_p11 = por %p2289_p10, %p2288_p9 }
  0xa3   : > { %p2284_p8 = pneg %p2283_p6 }
  0xa5   : > { %p2291_p12 = pnand %p2290_p11, %p2284_p8 }
  0xa7   : > { %2294 = shalt.err (!%p2291_p12)
}
  0xa8   : > { %2032 = dma.hbm_to_vmem [thread:$0]  (!%p2584_p5), %s3157_s14, 1024, %s543_s25, [#allocation12], %s2442_s17, %s2442_s17, %s2443_s13  }
  0xa9   : > { %s1700_s2 = sadd.s32 4294967294, %s2437_s30   ;;  %s2715_s21 = sadd.s32 1, %s2437_s30  }
  0xaa   : > { %s46_s12 = sadd.s32 1, %s2433_s29  ;;  %s43_s18 = ssub.s32 %s2437_s30, %s2715_s21 }
  0xab   : > { %p53_p7 = scmp.ne.s32.totalorder %s2433_s29, %s2429_s28  ;;  %p44_p13 = scmp.eq.s32.totalorder %s43_s18, 0 }
  0xac   : > { %p54_p0 = scmp.eq.s32.totalorder %s2437_s30, 0  ;;  %p59_p1 = scmp.ne.s32.totalorder %s2429_s28, %s2425_s27 }
  0xad   : > { %p445_p3 = scmp.eq.s32.totalorder %s2569_s1, 3  ;;  %p3159_p4 = scmp.eq.s32.totalorder %s2569_s1, 0 }
  0xae   : > { %s2727_s0 = scalar_select %p44_p13, %s2433_s29, %s46_s12  }
  0xaf   : > { %p55_p2 = por %p54_p0, %p53_p7  ;;  %p2731_p6 = por %p3159_p4, %p59_p1 }
  0xb0   : > { %3158 = sst [smem:[#allocation22_spill]] %s2727_s0  ;;  %p2735_p5 = por %p445_p3, %p53_p7 }
  0xb1   : > { %s3160_s26 = scalar_select %p2731_p6, 1, 0 }
  0xb2   : > { %s3161_s17 = scalar_select %p2735_p5, 1, 0 }
  0xb3   : > { %p451_p8 = scmp.eq.s32.totalorder %s1700_s2, 3  ;;  %p2049_p9 = scmp.lt.s32.totalorder %s2437_s30, 4 }
  0xb4   : > { %s565_s13 = sand.u32 1, %s2433_s29   ;;  %s1709_s15 = sshll.u32 %s2437_s30, 7 }
  0xb5   : > { %p2741_p10 = por %p451_p8, %p59_p1  ;;  %s2745_s23 = sshll.u32 %s565_s13, 3 }
  0xb6   : > { %s3163_s11 = sld [smem:[#allocation23_spill]]  ;;  %s569_s16 = scalar_lea.vmem [#allocation2], %s2745_s23 }
  0xb7   : > { %s3162_s25 = scalar_select %p2741_p10, 1, 0 }
  0xb8   : > { %s576_s5 = sshll.u32 %s569_s16, 4  ;;  %p2754_p11 = pnand %p2049_p9, %p55_p2  ;;  %s2758_s5 = int_to_ptr.vmem [resolvable:$true] %s576_s5 }
  0xb9   : > { %s3165_s7 = sld [smem:[#allocation24_spill]]  ;;  %s566_s22 = scalar_lea.sflag [#allocation3], %s565_s13 }
  0xba   : > { %p2297_p7 = pneg %p2754_p11 }
  0xbc   : > { %s2751_s24 = scalar_lea.hbm %s3163_s11, %s1709_s15  ;;  %s2300_s14 = scalar_lea.hbm %s3163_s11, 512 }
  0xbd   : > { %s2295_s9 = scalar_lea.hbm %s2751_s24, 128  ;;  %p2301_p1 = scmp.lt.u32.totalorder %s2751_s24, %s3163_s11 }
  0xbe   : > { %p2296_p12 = scmp.ne.s32.totalorder %s2751_s24, %s2295_s9  ;;  %p2302_p3 = scmp.lt.u32.totalorder %s2300_s14, %s2295_s9 }
  0xbf   : > { %s2763_s19 = scalar_lea.hbm %s3165_s7, %s1709_s15  ;;  %p2304_p4 = scmp.lt.u32.totalorder %s2295_s9, %s2751_s24 }
  0xc0   : > { %p2298_p13 = pnand %p2297_p7, %p2296_p12  ;;  %p2303_p2 = por %p2302_p3, %p2301_p1 }
  0xc2   : > { %p2299_p0 = pneg %p2298_p13  ;;  %p2305_p8 = por %p2304_p4, %p2303_p2 }
  0xc4   : > { %p2306_p9 = pnand %p2305_p8, %p2299_p0 }
  0xc6   : > { %2309 = shalt.err (!%p2306_p9)
}
  0xc7   : > { %s2310_s13 = scalar_lea.vmem %s2758_s5, 128  ;;  %s2446_s10 = smov [#allocation2]  }
  0xc8   : > { %p2311_p12 = scmp.ne.s32.totalorder %s2758_s5, %s2310_s13  ;;  %s2315_s15 = sshll.u32 %s2446_s10, 4  ;;  %s2316_s15 = int_to_ptr.vmem [resolvable:$false] %s2315_s15 }
  0xc9   : > { %s2317_s29 = scalar_lea.vmem %s2316_s15, 256  ;;  %p2318_p5 = scmp.lt.s32.totalorder %s2758_s5, %s2316_s15 }
  0xca   : > { %p2313_p13 = pnand %p2311_p12, %p2297_p7  ;;  %p2319_p1 = scmp.lt.s32.totalorder %s2317_s29, %s2310_s13 }
  0xcc   : > { %p2314_p10 = pneg %p2313_p13  ;;  %p2320_p3 = por %p2319_p1, %p2318_p5 }
  0xce   : > { %p2321_p2 = pnand %p2320_p3, %p2314_p10 }
  0xd0   : > { %2324 = shalt.err (!%p2321_p2)
}
  0xd1   : > { %2036 = dma.hbm_to_vmem [thread:$0]  (!%p2754_p11), %s2751_s24, 128, %s2758_s5, %s566_s22  }
  0xd2   : > { %s583_s9 = sand.u32 1, %s2437_s30   ;;  %s587_s14 = scalar_lea.vmem [#allocation5], %s2745_s23 }
  0xd3   : > { %s594_s0 = sshll.u32 %s587_s14, 4  ;;  %s584_s12 = scalar_lea.sflag [#allocation6], %s583_s9  ;;  %s595_s0 = int_to_ptr.vmem [resolvable:$true] %s594_s0 }
  0xd4   : > { %s2325_s18 = scalar_lea.hbm %s2763_s19, 128  ;;  %s2330_s10 = scalar_lea.hbm %s3165_s7, 512 }
  0xd5   : > { %p2326_p5 = scmp.ne.s32.totalorder %s2763_s19, %s2325_s18  ;;  %p2331_p4 = scmp.lt.u32.totalorder %s2763_s19, %s3165_s7 }
  0xd6   : > { %p2332_p8 = scmp.lt.u32.totalorder %s2330_s10, %s2325_s18  ;;  %p2334_p12 = scmp.lt.u32.totalorder %s2325_s18, %s2763_s19 }
  0xd7   : > { %p2328_p10 = pnand %p2326_p5, %p2297_p7 }
  0xd8   : > { %p2333_p9 = por %p2332_p8, %p2331_p4 }
  0xd9   : > { %p2329_p0 = pneg %p2328_p10 }
  0xda   : > { %p2335_p13 = por %p2334_p12, %p2333_p9 }
  0xdc   : > { %p2336_p1 = pnand %p2335_p13, %p2329_p0 }
  0xde   : > { %2339 = shalt.err (!%p2336_p1)
}
  0xdf   : > { %s2340_s23 = scalar_lea.vmem %s595_s0, 128  ;;  %s2447_s24 = smov [#allocation5]  }
  0xe0   : > { %p2341_p3 = scmp.ne.s32.totalorder %s595_s0, %s2340_s23  ;;  %s2345_s5 = sshll.u32 %s2447_s24, 4  ;;  %s2346_s5 = int_to_ptr.vmem [resolvable:$false] %s2345_s5 }
  0xe1   : > { %s2347_s22 = scalar_lea.vmem %s2346_s5, 256  ;;  %p2348_p10 = scmp.lt.s32.totalorder %s595_s0, %s2346_s5 }
  0xe2   : > { %p2343_p2 = pnand %p2341_p3, %p2297_p7  ;;  %p2349_p6 = scmp.lt.s32.totalorder %s2347_s22, %s2340_s23 }
  0xe4   : > { %p2344_p5 = pneg %p2343_p2  ;;  %p2350_p4 = por %p2349_p6, %p2348_p10 }
  0xe6   : > { %p2351_p8 = pnand %p2350_p4, %p2344_p5 }
  0xe8   : > { %2354 = shalt.err (!%p2351_p8)
}
  0xe9   : > { %2039 = dma.hbm_to_vmem [thread:$0]  (!%p2754_p11), %s2763_s19, 128, %s595_s0, %s584_s12  }
  0xea   : > { %p3166_p0 = scmp.ne.s32.totalorder %s3150_s20, 0 }
  0xeb   : > { %s2814_s9 = sand.u32 (!%p3166_p0), 1, %s2429_s28   ;;  %p3167_p6 = scmp.ne.s32.totalorder (!%p3166_p0), %s3160_s26, 0 }
  0xec   : > { %603 = sbr.rel (%p3166_p0) target bundleno = 2163 (0x873), region = 92  ;;  %s2817_s14 = sshll.u32 (!%p3166_p0), %s2814_s9, 3 }
  0xed   : > { %s606_s18 = scalar_lea.sflag (!%p3166_p0), [#allocation3], %s2814_s9  ;;  %s609_s16 = scalar_lea.vmem (!%p3166_p0), [#allocation2], %s2817_s14 }
  0xf3   : > { %2400 = dma.done.wait (%p3167_p6), %s606_s18, 128  }
  0xf4   : > { %2402 = vsyncadd (%p3167_p6), %s606_s18, 4294967168  ;;  %s614_s20 = sand.u32 1, %s2569_s1   ;;  %s618_s19 = scalar_lea.vmem [#allocation5], %s2817_s14 }
  0xf5   : > { %s615_s2 = scalar_lea.sflag [#allocation6], %s614_s20 }
  0xf6   : > { %2404 = dma.done.wait (%p3167_p6), %s615_s2, 128  }
  0xf7   : > { %2406 = vsyncadd (%p3167_p6), %s615_s2, 4294967168  ;;  %p3168_p11 = scmp.eq.s32.totalorder %s2569_s1, 0 }
  0xf9   : > { %2408 = dma.done.wait (%p3168_p11), [#allocation6], 512   ;;  %p3169_p7 = pmov %p3168_p11 }
  0xfb   : > { %2410 = vsyncadd (%p3169_p7), [#allocation6], 4294966784  ;;  %p3170_p9 = pmov %p3169_p7 }
  0xfc   : > { %p3171_p12 = pmov %p3169_p7 }
  0xfd   : > { %2412 = dma.done.wait (%p3170_p9), [#allocation9], 32  }
  0xfe   : > { %2414 = vsyncadd (%p3171_p12), [#allocation9], 4294967264  ;;  %p3172_p13 = pmov %p3169_p7 }
  0xff   : > { %p3173_p1 = pmov %p3169_p7 }
 0x100   : > { %2416 = dma.done.wait (%p3172_p13), [#allocation12], 1280  }
 0x101   : > { %2418 = vsyncadd (%p3173_p1), [#allocation12], 4294966016  ;;  %v2448_v0 = vmov 0.0   ;;  %vm2449_vm0 = vmmov 0   ;;  %v2099_v1 = vld [vmem:[#allocation7] sm:$0xff]   ;;  %v2100_v2 = vld [vmem:[#allocation7 + $0x8] sm:$0xff]  }
 0x102   : > { %1851 = vmatprep.subr.bf16.mxu1 %v2448_v0  ;;  %1859 = vmatprep.mubr.msk.bf16.mxu1 %vm2449_vm0, %v2448_v0  ;;  %v2101_v3 = vld [vmem:[#allocation7 + $0x10] sm:$0xff]   ;;  %v2102_v4 = vld [vmem:[#allocation7 + $0x18] sm:$0xff]   ;;  %v697_v5 = vld [vmem:[%s609_s16] sm:$0xff]  ;;  %vm738_vm1 = vcmask 523264   ;;  %s3174_s13 = sld [smem:[#allocation26_spill]]  ;;  %s2450_s24 = smov 96  }
 0x103   : > { %1883 = vmatprep.subr.bf16.mxu0 %v2448_v0  ;;  %1899 = vmatprep.mubr.msk.bf16.mxu0 %vm2449_vm0, %v2448_v0  ;;  %v2103_v6 = vld [vmem:[%s3107_s4] sm:$0xff]   ;;  %v698_v7 = vpack.c.bf16 %v697_v5, %v697_v5  ;;  %v2104_v8 = vld [vmem:[%s3107_s4 + $0x8] sm:$0xff]   ;;  %v2105_v9 = vld [vmem:[%s3107_s4 + $0x10] sm:$0xff]   ;;  %s2451_s5 = smov 64   ;;  %vm1155_vm2 = vcmask 261120   ;;  %s3175_s16 = sld [smem:[#allocation31_spill]] }
 0x104   : > { %1852 = vmatpush3.bf16.msra.mxu1 %v2099_v1  ;;  %v2106_v10 = vld [vmem:[%s3107_s4 + $0x18] sm:$0xff]   ;;  %v2107_v11 = vld [vmem:[%s3107_s4 + $0x20] sm:$0xff]   ;;  %v2108_v12 = vld [vmem:[%s3107_s4 + $0x28] sm:$0xff]   ;;  %s3176_s2 = sld [smem:[#allocation30_spill]]  ;;  %s3177_s0 = sld [smem:[#allocation35_spill]]  ;;  %vm1543_vm3 = vcmask 785408  }
 0x105   : > { %1853 = vmatprep.subr.bf16.mxu1 %v2448_v0  ;;  %v2109_v13 = vld [vmem:[%s3107_s4 + $0x30] sm:$0xff]   ;;  %v2110_v14 = vld [vmem:[%s3107_s4 + $0x38] sm:$0xff]   ;;  %v2111_v15 = vld [vmem:[%s3109_s6] sm:$0xff]   ;;  %s3179_s23 = sld [smem:[#allocation34_spill]]  ;;  %s3180_s22 = sld [smem:[#allocation36_spill]] }
 0x106   : > { %1884 = vmatpush3.bf16.msra.mxu0 %v2111_v15  ;;  %v2112_v16 = vld [vmem:[%s3109_s6 + $0x8] sm:$0xff]   ;;  %v2113_v17 = vld [vmem:[%s3109_s6 + $0x10] sm:$0xff]   ;;  %v2114_v18 = vld [vmem:[%s3109_s6 + $0x18] sm:$0xff]   ;;  %s1786_s18 = sshll.u32 %s2569_s1, 7  ;;  %s695_s20 = scalar_lea.vmem [#allocation14], %s2817_s14 }
 0x107   : > { %1885 = vmatprep.subr.bf16.mxu0 %v2448_v0  ;;  %v2115_v19 = vld [vmem:[%s3109_s6 + $0x20] sm:$0xff]   ;;  %v2116_v20 = vld [vmem:[%s3109_s6 + $0x28] sm:$0xff]   ;;  %v2117_v28 = vld [vmem:[%s3109_s6 + $0x30] sm:$0xff]   ;;  %s3181_s12 = sld [smem:[#allocation37_spill]]  ;;  %s1547_s1 = scalar_lea.sflag [#allocation4], %s2814_s9 }
 0x108   : > { %1854 = vmatpush3.bf16.msra.mxu1 %v2100_v2  ;;  %v1721_v21 = vld [vmem:[%s3106_s3] ss:$0 sm:$0xff]  ;;  %v2118_v29 = vld [vmem:[%s3109_s6 + $0x38] sm:$0xff]   ;;  %v2120_v31 = vld [vmem:[%s3111_s8 + $0x8] sm:$0xff]   ;;  %p3182_p2 = scmp.ne.s32.totalorder %s3161_s17, 0  ;;  %s2452_s10 = smov [#allocation14]  }
 0x109   : > { %1855 = vmatprep.subr.bf16.mxu1 %v2448_v0  ;;  %v2119_v30 = vld [vmem:[%s3111_s8] sm:$0xff]   ;;  %v2121_v32 = vld [vmem:[%s3111_s8 + $0x10] sm:$0xff]   ;;  %v2122_v33 = vld [vmem:[%s3111_s8 + $0x18] sm:$0xff]   ;;  %s2359_s15 = sshll.u32 %s2452_s10, 4  ;;  %s2360_s15 = int_to_ptr.vmem [resolvable:$false] %s2359_s15 }
 0x10a   : > { %1886 = vmatpush3.bf16.msra.mxu0 %v2112_v16  ;;  %v2123_v34 = vld [vmem:[%s3111_s8 + $0x20] sm:$0xff]   ;;  %v2124_v35 = vld [vmem:[%s3111_s8 + $0x28] sm:$0xff]   ;;  %v2125_v44 = vld [vmem:[%s3111_s8 + $0x30] sm:$0xff]   ;;  %s2361_s29 = scalar_lea.vmem %s2360_s15, 256 }
 0x10b   : > { %1887 = vmatprep.subr.bf16.mxu0 %v2448_v0  ;;  %v1727_v36 = vld [vmem:[%s3174_s13] ss:$0 sm:$0xff]  ;;  %v2126_v45 = vld [vmem:[%s3111_s8 + $0x38] sm:$0xff]   ;;  %v2127_v55 = vld [vmem:[#allocation11] sm:$0xff]  }
 0x10c   : > { %1856 = vmatpush3.bf16.msra.mxu1 %v2101_v3  ;;  %v1736_v46 = vld [vmem:[#allocation8] ss:$0 sm:$0xff]  ;;  %v1745_v56 = vld [vmem:[#allocation10] ss:$0 sm:$0xff]  ;;  %v2128_v1 = vld [vmem:[#allocation11 + $0x8] sm:$0xff]  }
 0x10d   : > { %1857 = vmatprep.subr.bf16.mxu1 %v2448_v0  ;;  %v1121_v3 = vld [vmem:[%s618_s19] sm:$0xff]  ;;  %s3178_s19 = sld [smem:[#allocation32_spill]]  ;;  %s3060_s13 = scalar_lea.hbm %s3181_s12, %s1786_s18 }
 0x10e   : > { %1888 = vmatpush3.bf16.msra.mxu0 %v2113_v17  ;;  %v2136_v15 = vld [vmem:[%s3175_s16 + $0x38] sm:$0xff]  }
 0x10f   : > { %1889 = vmatprep.subr.bf16.mxu0 %v2448_v0  ;;  %v2137_v16 = vld [vmem:[#allocation13] sm:$0xff]   ;;  %v2138_v17 = vld [vmem:[#allocation13 + $0x8] sm:$0xff]  }
 0x110   : > { %1858 = vmatpush3.bf16.msra.mxu1 %v2102_v4 }
 0x111   : > { %1863 = vmatprep.subr.bf16.mxu1 %v2448_v0 }
 0x112   : > { %1890 = vmatpush3.bf16.msra.mxu0 %v2114_v18  ;;  %v2139_v18 = vld [vmem:[#allocation13 + $0x10] sm:$0xff]  }
 0x113   : > { %1860 = vmatmul.mubr.msk.bf16.vlgmr.msra.gmra.mrb[0].mxu1 %vm738_vm1, %v698_v7  ;;  %1891 = vmatprep.subr.bf16.mxu0 %v2448_v0  ;;  %v2129_v7 = vld [vmem:[%s3175_s16] sm:$0xff]  }
 0x114   : > { %1864 = vmatpush3.bf16.msra.mxu1 %v2103_v6  ;;  %1879 = vmatprep.mubr.msk.bf16.mxu1 %vm2449_vm0, %v2448_v0 }
 0x115   : > { %1865 = vmatprep.subr.bf16.mxu1 %v2448_v0 }
 0x116   : > { %1892 = vmatpush3.bf16.msra.mxu0 %v2115_v19  ;;  %v2140_v19 = vld [vmem:[#allocation13 + $0x18] sm:$0xff]  }
 0x117   : > { %1893 = vmatprep.subr.bf16.mxu0 %v2448_v0 }
 0x118   : > { %1866 = vmatpush3.bf16.msra.mxu1 %v2104_v8 }
 0x119   : > { %1867 = vmatprep.subr.bf16.mxu1 %v2448_v0 }
 0x11a   : > { %1894 = vmatpush3.bf16.msra.mxu0 %v2116_v20  ;;  %v2141_v20 = vld [vmem:[#allocation13 + $0x20] sm:$0xff]  }
 0x11b   : > { %1895 = vmatprep.subr.bf16.mxu0 %v2448_v0 }
 0x11c   : > { %1868 = vmatpush3.bf16.msra.mxu1 %v2105_v9  ;;  %v2130_v9 = vld [vmem:[%s3175_s16 + $0x8] sm:$0xff]  }
 0x11d   : > { %1869 = vmatprep.subr.bf16.mxu1 %v2448_v0 }
 0x11e   : > { %1896 = vmatpush3.bf16.msra.mxu0 %v2117_v28 }
 0x11f   : > { %1897 = vmatprep.subr.bf16.mxu0 %v2448_v0 }
 0x120   : > { %1870 = vmatpush3.bf16.msra.mxu1 %v2106_v10  ;;  %v2131_v10 = vld [vmem:[%s3175_s16 + $0x10] sm:$0xff]  }
 0x121   : > { %1871 = vmatprep.subr.bf16.mxu1 %v2448_v0 }
 0x122   : > { %1898 = vmatpush3.bf16.msra.mxu0 %v2118_v29  ;;  %v2143_v29 = vld [vmem:[#allocation13 + $0x30] sm:$0xff]  }
 0x123   : > { %1923 = vmatprep.subr.bf16.mxu0 %v2448_v0 }
 0x124   : > { %1872 = vmatpush3.bf16.msra.mxu1 %v2107_v11  ;;  %v2132_v11 = vld [vmem:[%s3175_s16 + $0x18] sm:$0xff]  }
 0x125   : > { %1873 = vmatprep.subr.bf16.mxu1 %v2448_v0 }
 0x128   : > { %1874 = vmatpush3.bf16.msra.mxu1 %v2108_v12  ;;  %v2133_v12 = vld [vmem:[%s3175_s16 + $0x20] sm:$0xff]  }
 0x129   : > { %1875 = vmatprep.subr.bf16.mxu1 %v2448_v0 }
 0x12c   : > { %1876 = vmatpush3.bf16.msra.mxu1 %v2109_v13  ;;  %v2134_v13 = vld [vmem:[%s3175_s16 + $0x28] sm:$0xff]  }
 0x12d   : > { %1877 = vmatprep.subr.bf16.mxu1 %v2448_v0 }
 0x130   : > { %1878 = vmatpush3.bf16.msra.mxu1 %v2110_v14  ;;  %v2135_v14 = vld [vmem:[%s3175_s16 + $0x30] sm:$0xff]  }
 0x131   : > { %1903 = vmatprep.subr.bf16.mxu1 %v2448_v0 }
 0x1e6   : > { %v776_v22 = vpop.f32.mrb[0].mxu1 }
 0x1e7   : > { %v777_v23 = vadd.f32 %v1721_v21, %v776_v22  ;;  %v1861_v24 = vpop.f32.mrb[1].mxu1  ;;  %v2142_v21 = vld [vmem:[#allocation13 + $0x28] sm:$0xff]  }
 0x1e8   : > { %v779_v25 = vpop.f32.mrb[2].mxu1  ;;  %v1754_v22 = vld [vmem:[%s3176_s2] ss:$0 sm:$0xff]  ;;  %s1560_s2 = sshll.u32 %s695_s20, 4  ;;  %s3062_s2 = int_to_ptr.vmem [resolvable:$true] %s1560_s2 }
 0x1e9   : > { %v782_v26 = vpack.c.bf16 %v777_v23, %v777_v23  ;;  %v1862_v27 = vpop.f32.mrb[3].mxu1  ;;  %s2355_s14 = scalar_lea.vmem %s3062_s2, 128  ;;  %p2362_p4 = scmp.lt.s32.totalorder %s3062_s2, %s2360_s15 }
 0x1ea   : > { %p2356_p3 = scmp.ne.s32.totalorder %s3062_s2, %s2355_s14  ;;  %p2363_p8 = scmp.lt.s32.totalorder %s2361_s29, %s2355_s14 }
 0x1eb   : > { %1880 = vmatmul.mubr.bf16.vlgmr.msra.gmra.mrb[4].mxu1 %v782_v26 }
 0x1ec   : > { %1919 = vmatprep.mubr.msk.bf16.mxu1 %vm2449_vm0, %v2448_v0  ;;  %1904 = vmatpush3.bf16.msra.mxu1 %v2119_v30  ;;  %v2144_v30 = vld [vmem:[#allocation13 + $0x38] sm:$0xff]   ;;  %p2357_p5 = pnand %p2356_p3, %p3182_p2  ;;  %p2364_p0 = por %p2363_p8, %p2362_p4 }
 0x1ed   : > { %1905 = vmatprep.subr.bf16.mxu1 %v2448_v0 }
 0x1ee   : > { %p2358_p10 = pneg %p2357_p5 }
 0x1f0   : > { %1906 = vmatpush3.bf16.msra.mxu1 %v2120_v31  ;;  %v2145_v31 = vld [vmem:[%s3177_s0] sm:$0xff]   ;;  %p2365_p6 = pnand %p2364_p0, %p2358_p10 }
 0x1f1   : > { %1907 = vmatprep.subr.bf16.mxu1 %v2448_v0 }
 0x1f4   : > { %1908 = vmatpush3.bf16.msra.mxu1 %v2121_v32  ;;  %v2146_v32 = vld [vmem:[%s3177_s0 + $0x8] sm:$0xff]  }
 0x1f5   : > { %1909 = vmatprep.subr.bf16.mxu1 %v2448_v0 }
 0x1f8   : > { %1910 = vmatpush3.bf16.msra.mxu1 %v2122_v33  ;;  %v2147_v33 = vld [vmem:[%s3177_s0 + $0x10] sm:$0xff]  }
 0x1f9   : > { %1911 = vmatprep.subr.bf16.mxu1 %v2448_v0 }
 0x1fc   : > { %1912 = vmatpush3.bf16.msra.mxu1 %v2123_v34  ;;  %v2148_v34 = vld [vmem:[%s3177_s0 + $0x18] sm:$0xff]  }
 0x1fd   : > { %1913 = vmatprep.subr.bf16.mxu1 %v2448_v0 }
 0x200   : > { %1914 = vmatpush3.bf16.msra.mxu1 %v2124_v35  ;;  %v2149_v35 = vld [vmem:[%s3177_s0 + $0x20] sm:$0xff]  }
 0x201   : > { %1915 = vmatprep.subr.bf16.mxu1 %v2448_v0 }
 0x204   : > { %1916 = vmatpush3.bf16.msra.mxu1 %v2125_v44 }
 0x205   : > { %1917 = vmatprep.subr.bf16.mxu1 %v2448_v0 }
 0x208   : > { %1918 = vmatpush3.bf16.msra.mxu1 %v2126_v45  ;;  %v2151_v45 = vld [vmem:[%s3177_s0 + $0x30] sm:$0xff]  }
 0x209   : > { %1951 = vmatprep.subr.bf16.mxu1 %v2448_v0 }
 0x2be   : > { %v888_v37 = vpop.f32.mrb[4].mxu1 }
 0x2bf   : > { %v889_v38 = vadd.f32 %v1727_v36, %v888_v37  ;;  %v1881_v39 = vpop.f32.mrb[5].mxu1  ;;  %v2150_v36 = vld [vmem:[%s3177_s0 + $0x28] sm:$0xff]   ;;  %v1758_v37 = vld [vmem:[%s3178_s19] ss:$0 sm:$0xff] }
 0x2c0   : > { %v891_v40 = vpop.f32.mrb[6].mxu1 }
 0x2c1   : > { %v894_v41 = vmax.f32 %v889_v38, 0.0  ;;  %v1882_v42 = vpop.f32.mrb[7].mxu1 }
 0x2c3   : > { %v895_v43 = vpack.c.bf16 %v894_v41, %v894_v41 }
 0x2c5   : > { %1900 = vmatmul.mubr.bf16.vlgmr.msra.gmra.mrb[0].mxu0 %v895_v43 }
 0x2c6   : > { %1927 = vmatprep.mubr.msk.bf16.mxu0 %vm2449_vm0, %v2448_v0  ;;  %1924 = vmatpush3.bf16.msra.mxu0 %v2127_v55 }
 0x2c7   : > { %1925 = vmatprep.subr.bf16.mxu0 %v2448_v0 }
 0x2ca   : > { %1926 = vmatpush3.bf16.msra.mxu0 %v2128_v1 }
 0x2cb   : > { %1931 = vmatprep.subr.bf16.mxu0 %v2448_v0 }
 0x398   : > { %v1001_v47 = vpop.f32.mrb[0].mxu0 }
 0x399   : > { %v1002_v48 = vadd.f32 %v1736_v46, %v1001_v47  ;;  %v1901_v49 = vpop.f32.mrb[1].mxu0  ;;  %v2152_v46 = vld [vmem:[%s3177_s0 + $0x38] sm:$0xff]   ;;  %v1767_v47 = vld [vmem:[%s3179_s23] ss:$0 sm:$0xff] }
 0x39a   : > { %v1004_v50 = vpop.f32.mrb[2].mxu0 }
 0x39b   : > { %v1007_v51 = vadd.f32 %v1002_v48, %v777_v23  ;;  %v1902_v52 = vpop.f32.mrb[3].mxu0 }
 0x39d   : > { %v1008_v53 = vmax.f32 %v1007_v51, 0.0 }
 0x39f   : > { %v1009_v54 = vpack.c.bf16 %v1008_v53, %v1008_v53 }
 0x3a1   : > { %1920 = vmatmul.mubr.bf16.vlgmr.msra.gmra.mrb[8].mxu1 %v1009_v54 }
 0x3a2   : > { %1967 = vmatprep.mubr.msk.bf16.mxu1 %vm2449_vm0, %v2448_v0  ;;  %1952 = vmatpush3.bf16.msra.mxu1 %v2137_v16 }
 0x3a3   : > { %1953 = vmatprep.subr.bf16.mxu1 %v2448_v0 }
 0x3a6   : > { %1954 = vmatpush3.bf16.msra.mxu1 %v2138_v17 }
 0x3a7   : > { %1955 = vmatprep.subr.bf16.mxu1 %v2448_v0 }
 0x3aa   : > { %1956 = vmatpush3.bf16.msra.mxu1 %v2139_v18 }
 0x3ab   : > { %1957 = vmatprep.subr.bf16.mxu1 %v2448_v0 }
 0x3ae   : > { %1958 = vmatpush3.bf16.msra.mxu1 %v2140_v19 }
 0x3af   : > { %1959 = vmatprep.subr.bf16.mxu1 %v2448_v0 }
 0x3b2   : > { %1960 = vmatpush3.bf16.msra.mxu1 %v2141_v20 }
 0x3b3   : > { %1961 = vmatprep.subr.bf16.mxu1 %v2448_v0 }
 0x3b6   : > { %1962 = vmatpush3.bf16.msra.mxu1 %v2142_v21 }
 0x3b7   : > { %1963 = vmatprep.subr.bf16.mxu1 %v2448_v0 }
 0x3ba   : > { %1964 = vmatpush3.bf16.msra.mxu1 %v2143_v29 }
 0x3bb   : > { %1965 = vmatprep.subr.bf16.mxu1 %v2448_v0 }
 0x3be   : > { %1966 = vmatpush3.bf16.msra.mxu1 %v2144_v30 }
 0x474   : > { %v1115_v57 = vpop.f32.mrb[8].mxu1 }
 0x475   : > { %v1116_v58 = vadd.f32 %v1745_v56, %v1115_v57  ;;  %v1921_v59 = vpop.f32.mrb[9].mxu1 }
 0x476   : > { %v1118_v60 = vpop.f32.mrb[10].mxu1 }
 0x477   : > { %v1122_v61 = vmul.f32 0.5, %v1116_v58  ;;  %v1922_v62 = vpop.f32.mrb[11].mxu1 }
 0x479   : > { %v1123_v63 = vmul.f32 1.442695, %v1122_v61 }
 0x47b   : > { %2153 = vpow2.f32 %v1123_v63 }
 0x485   : > { %v2154_v2 = vpop.eup %2153 }
 0x486   : > { %1126 = vrot.lane.b32.xlu0 %v2154_v2, %s2450_s24 }
 0x48a   : > { %1539 = vrot.lane.b32.xlu0 %v1116_v58, %s2451_s5 }
 0x4f8   : > { %v1127_v4 = vpop.permute.xlu0 %1126 }
 0x4f9   : > { %v1129_v5 = vmul.f32 %v1127_v4, %v1121_v3 }
 0x4fb   : > { %v1130_v6 = vadd.f32 %v1129_v5, %v1116_v58 }
 0x4fc   : > { %v1540_v59 = vpop.permute.xlu0 %1539 }
 0x4fd   : > { %v1131_v8 = vpack.c.bf16 %v1130_v6, %v1130_v6 }
 0x4ff   : > { %1928 = vmatmul.mubr.msk.bf16.vlgmr.msra.gmra.mrb[4].mxu0 %vm1155_vm2, %v1131_v8 }
 0x500   : > { %1932 = vmatpush3.bf16.msra.mxu0 %v2129_v7  ;;  %1947 = vmatprep.mubr.msk.bf16.mxu0 %vm2449_vm0, %v2448_v0 }
 0x501   : > { %1933 = vmatprep.subr.bf16.mxu0 %v2448_v0 }
 0x504   : > { %1934 = vmatpush3.bf16.msra.mxu0 %v2130_v9 }
 0x505   : > { %1935 = vmatprep.subr.bf16.mxu0 %v2448_v0 }
 0x508   : > { %1936 = vmatpush3.bf16.msra.mxu0 %v2131_v10 }
 0x509   : > { %1937 = vmatprep.subr.bf16.mxu0 %v2448_v0 }
 0x50c   : > { %1938 = vmatpush3.bf16.msra.mxu0 %v2132_v11 }
 0x50d   : > { %1939 = vmatprep.subr.bf16.mxu0 %v2448_v0 }
 0x510   : > { %1940 = vmatpush3.bf16.msra.mxu0 %v2133_v12 }
 0x511   : > { %1941 = vmatprep.subr.bf16.mxu0 %v2448_v0 }
 0x514   : > { %1942 = vmatpush3.bf16.msra.mxu0 %v2134_v13 }
 0x515   : > { %1943 = vmatprep.subr.bf16.mxu0 %v2448_v0 }
 0x518   : > { %1944 = vmatpush3.bf16.msra.mxu0 %v2135_v14 }
 0x519   : > { %1945 = vmatprep.subr.bf16.mxu0 %v2448_v0 }
 0x51c   : > { %1946 = vmatpush3.bf16.msra.mxu0 %v2136_v15 }
 0x51d   : > { %1971 = vmatprep.subr.bf16.mxu0 %v2448_v0 }
 0x5d2   : > { %v1193_v23 = vpop.f32.mrb[4].mxu0 }
 0x5d3   : > { %v1194_v24 = vadd.f32 %v1754_v22, %v1193_v23  ;;  %v1929_v25 = vpop.f32.mrb[5].mxu0 }
 0x5d4   : > { %v1196_v26 = vpop.f32.mrb[6].mxu0 }
 0x5d5   : > { %v1199_v27 = vpack.c.bf16 %v1194_v24, %v1194_v24  ;;  %v1930_v28 = vpop.f32.mrb[7].mxu0 }
 0x5d7   : > { %1948 = vmatmul.mubr.bf16.vlgmr.msra.gmra.mrb[8].mxu0 %v1199_v27 }
 0x5d8   : > { %1987 = vmatprep.mubr.msk.bf16.mxu0 %vm2449_vm0, %v2448_v0  ;;  %1972 = vmatpush3.bf16.msra.mxu0 %v2145_v31 }
 0x5d9   : > { %1973 = vmatprep.subr.bf16.mxu0 %v2448_v0 }
 0x5dc   : > { %1974 = vmatpush3.bf16.msra.mxu0 %v2146_v32 }
 0x5dd   : > { %1975 = vmatprep.subr.bf16.mxu0 %v2448_v0 }
 0x5e0   : > { %1976 = vmatpush3.bf16.msra.mxu0 %v2147_v33 }
 0x5e1   : > { %1977 = vmatprep.subr.bf16.mxu0 %v2448_v0 }
 0x5e4   : > { %1978 = vmatpush3.bf16.msra.mxu0 %v2148_v34 }
 0x5e5   : > { %1979 = vmatprep.subr.bf16.mxu0 %v2448_v0 }
 0x5e8   : > { %1980 = vmatpush3.bf16.msra.mxu0 %v2149_v35 }
 0x5e9   : > { %1981 = vmatprep.subr.bf16.mxu0 %v2448_v0 }
 0x5ec   : > { %1982 = vmatpush3.bf16.msra.mxu0 %v2150_v36 }
 0x5ed   : > { %1983 = vmatprep.subr.bf16.mxu0 %v2448_v0 }
 0x5f0   : > { %1984 = vmatpush3.bf16.msra.mxu0 %v2151_v45 }
 0x5f1   : > { %1985 = vmatprep.subr.bf16.mxu0 %v2448_v0  ;;  %v1776_v0 = vld [vmem:[%s3180_s22] ss:$0 sm:$0xff] }
 0x5f4   : > { %1986 = vmatpush3.bf16.msra.mxu0 %v2152_v46 }
 0x6aa   : > { %v1305_v38 = vpop.f32.mrb[8].mxu0 }
 0x6ab   : > { %v1306_v39 = vadd.f32 %v1758_v37, %v1305_v38  ;;  %v1949_v40 = vpop.f32.mrb[9].mxu0 }
 0x6ac   : > { %v1308_v41 = vpop.f32.mrb[10].mxu0 }
 0x6ad   : > { %v1311_v42 = vmax.f32 %v1306_v39, 0.0  ;;  %v1950_v43 = vpop.f32.mrb[11].mxu0 }
 0x6af   : > { %v1312_v44 = vpack.c.bf16 %v1311_v42, %v1311_v42 }
 0x6b1   : > { %1968 = vmatmul.mubr.bf16.vlgmr.msra.gmra.mrb[12].mxu1 %v1312_v44 }
 0x784   : > { %v1418_v48 = vpop.f32.mrb[12].mxu1 }
 0x785   : > { %v1419_v49 = vadd.f32 %v1767_v47, %v1418_v48  ;;  %v1969_v50 = vpop.f32.mrb[13].mxu1 }
 0x786   : > { %v1421_v51 = vpop.f32.mrb[14].mxu1 }
 0x787   : > { %v1424_v52 = vadd.f32 %v1419_v49, %v1194_v24  ;;  %v1970_v53 = vpop.f32.mrb[15].mxu1 }
 0x789   : > { %v1425_v54 = vmax.f32 %v1424_v52, 0.0 }
 0x78b   : > { %v1426_v55 = vpack.c.bf16 %v1425_v54, %v1425_v54 }
 0x78d   : > { %1988 = vmatmul.mubr.bf16.vlgmr.msra.gmra.mrb[12].mxu0 %v1426_v55 }
 0x860   : > { %v1532_v56 = vpop.f32.mrb[12].mxu0 }
 0x861   : > { %v1533_v57 = vadd.f32 %v1776_v0, %v1532_v56  ;;  %v1989_v58 = vpop.f32.mrb[13].mxu0 }
 0x862   : > { %v1535_v60 = vpop.f32.mrb[14].mxu0 }
 0x863   : > { %v1542_v61 = vsel %vm738_vm1, %v1533_v57, %v1540_v59  ;;  %v1990_v62 = vpop.f32.mrb[15].mxu0 }
 0x864   : > { %v1544_v63 = vsel %vm1543_vm3, %v1542_v61, %v1540_v59 }
 0x865   : > { %1545 = vst [vmem:[%s695_s20] sm:$0xff] %v1544_v63 }
 0x866   : > { %2368 = shalt.err (!%p2365_p6)
}
 0x867   : > { %s2369_s9 = scalar_lea.hbm %s3060_s13, 128  ;;  %s2373_s5 = scalar_lea.hbm %s3181_s12, 512 }
 0x868   : > { %p2370_p11 = scmp.ne.s32.totalorder %s3060_s13, %s2369_s9  ;;  %p2374_p12 = scmp.lt.u32.totalorder %s3060_s13, %s3181_s12 }
 0x869   : > { %p2375_p13 = scmp.lt.u32.totalorder %s2373_s5, %s2369_s9  ;;  %p2377_p3 = scmp.lt.u32.totalorder %s2369_s9, %s3060_s13 }
 0x86a   : > { %p2371_p7 = pnand %p2370_p11, %p3182_p2 }
 0x86b   : > { %p2376_p1 = por %p2375_p13, %p2374_p12 }
 0x86c   : > { %p2372_p9 = pneg %p2371_p7 }
 0x86d   : > { %p2378_p5 = por %p2377_p3, %p2376_p1 }
 0x86f   : > { %p2379_p10 = pnand %p2378_p5, %p2372_p9 }
 0x871   : > { %2382 = shalt.err (!%p2379_p10)
}
 0x872   : > { %2015 = dma.vmem_to_hbm [thread:$0]  (%p3182_p2), %s3062_s2, 128, %s3060_s13, %s1547_s1  }
 0x873 PF: > { %p2055_p4 = scmp.ge.s32.totalorder %s2437_s30, 2  ;;  %s1572_s20 = sand.u32 1, %s2425_s27  }
 0x874   : > { %p3183_p8 = scmp.ne.s32.totalorder %s3162_s25, 0  ;;  %s1573_s19 = scalar_lea.sflag [#allocation4], %s1572_s20 }
 0x876   : > { %p2041_p0 = pnand %p2055_p4, %p3183_p8 }
 0x878   : > { %2420 = dma.done.wait (!%p2041_p0), %s1573_s19, 128  }
 0x879   : > { %2422 = vsyncadd (!%p2041_p0), %s1573_s19, 4294967168  ;;  %s3184_s26 = sld [smem:[#allocation21_spill]]  ;;  %s3185_s29 = sld [smem:[#allocation22_spill]] }
 0x87a   : > { %p36_p6 = scmp.ge.s32.totalorder %s2715_s21, 6   ;;  %s3186_s27 = smov %s2429_s28 }
 0x87b   : > { %s3188_s30 = smov %s2715_s21 }
 0x87c   :  { %38 = sbr.rel (!%p36_p6) target bundleno = 25 (0x19), region = 170 }
 0x87f   : > { %s3187_s28 = smov %s3184_s26 }
 0x883   :  { %1578 = vsyncpa [#allocation3], 1 }
 0x884   :  { %1580 = vsyncpa [#allocation3 + $0x1], 1 }
 0x885   :  { %1581 = vsyncpa [#allocation6], 1 }
 0x886   :  { %1583 = vsyncpa [#allocation6 + $0x1], 1 }
 0x887   :  { %1584 = vsyncpa [#allocation9], 1 }
 0x888   :  { %1585 = vsyncpa [#allocation12], 1 }
 0x889   :  { %1586 = vsyncpa [#allocation4], 1 }
 0x88a   :  { %1588 = vsyncpa [#allocation4 + $0x1], 1 }

</bundles_post_ra>
